<compile_context>
chip_gen: v5e
topology: v5e:2x2
jax: 0.10.0
libtpu: 0.0.40
codegen_flags: <defaults>
</compile_context>

<pallas_src>
import numpy as np
import jax
import jax.numpy as jnp
from jax import lax
from jax.experimental import pallas as pl
from jax.experimental.pallas import tpu as pltpu

LEAKY_SLOPE = 0.2  # pyGAT / SNEA SpGraphAttentionLayer default


def _round_up(x, m):
    return ((x + m - 1) // m) * m


def snea_gat_kernel(emb_rows_ref, emb_cols_ref, w_ref, wa1_ref, wa2_ref, adj_ref,
                    out_ref, acc_ref, rowsum_ref):
    """Fused bal+unbal GAT head, one (N_tile, M_tile) step.

    emb_rows_ref: (NT, Fin_p)   embed rows i*NT..   (source of f1 = a1.h[row])
    emb_cols_ref: (MT, Fin_p)   unique-node columns of this M tile
    w_ref:        (Fin_p, 2*Fp) [W_bal | W_unbal], zero padded
    wa1_ref:      (Fin_p, 2)    folded W_s @ a1_s  (col 0 = bal, col 1 = unbal)
    wa2_ref:      (Fin_p, 2)    folded W_s @ a2_s
    adj_ref:      (2, NT, MT)   bf16 edge counts
    out_ref:      (NT, 2*Fp)    lane-dense output slab
    acc_ref:      (NT, 2*Fp) f32 scratch, rowsum_ref: (NT, 2) f32 scratch
    """
    k = pl.program_id(1)
    fp2 = w_ref.shape[-1]
    fp = fp2 // 2

    @pl.when(k == 0)
    def _():
        acc_ref[...] = jnp.zeros_like(acc_ref)
        rowsum_ref[...] = jnp.zeros_like(rowsum_ref)

    # Fused projection of this column tile for both signs (one lane-dense MXU matmul).
    h_cols = jnp.dot(emb_cols_ref[...], w_ref[...],
                     preferred_element_type=jnp.float32)              # (MT, 2*Fp)

    # Attention-logit pieces from the folded vectors (tiny width-2 matmuls).
    f1 = jnp.dot(emb_rows_ref[...], wa1_ref[...],
                 preferred_element_type=jnp.float32)                  # (NT, 2)
    # Contract wa2 dim0 with emb_cols dim1 -> (2, MT): MT lands on lanes, no transpose needed.
    f2 = lax.dot_general(wa2_ref[...], emb_cols_ref[...], (((0,), (1,)), ((), ())),
                         preferred_element_type=jnp.float32)          # (2, MT)

    parts = []
    sums = []
    for s in range(2):                                                # static unroll: bal, unbal
        logits = f1[:, s:s + 1] + f2[s:s + 1, :]                      # (NT, MT)
        lrelu = jnp.where(logits >= 0, logits, LEAKY_SLOPE * logits)
        # exp(-leakyrelu) weighted by the edge count (0 if no edge, 2 if duplicated self/neighbor).
        e = jnp.exp(-lrelu) * adj_ref[s].astype(jnp.float32)          # (NT, MT)
        sums.append(jnp.sum(e, axis=-1, keepdims=True))               # (NT, 1) f32 partial rowsum
        h_s = h_cols[:, s * fp:(s + 1) * fp]                          # (MT, Fp)
        # bf16 MXU aggregation with f32 accumulation.
        parts.append(jnp.dot(e.astype(jnp.bfloat16), h_s.astype(jnp.bfloat16),
                             preferred_element_type=jnp.float32))     # (NT, Fp)

    acc_ref[...] += jnp.concatenate(parts, axis=-1)                   # (NT, 2*Fp)
    rowsum_ref[...] += jnp.concatenate(sums, axis=-1)                 # (NT, 2)

    @pl.when(k == pl.num_programs(1) - 1)
    def _():
        rs = rowsum_ref[...]
        rs = jnp.where(rs > 0, rs, 1.0)            # guard padded rows (no edges) against 0/0
        inv = pl.reciprocal(rs, approx=True)       # EUP slot, one per row per sign
        acc = acc_ref[...]
        hp = jnp.concatenate([acc[:, :fp] * inv[:, 0:1],
                              acc[:, fp:] * inv[:, 1:2]], axis=-1)    # (NT, 2*Fp)
        # ELU (concat=True branch of SpGraphAttentionLayer)
        out_ref[...] = jnp.where(hp > 0, hp, jnp.exp(hp) - 1.0).astype(out_ref.dtype)


def first_layer_aggregate(embed_matrix, w_stacked, a_stacked, adj_stacked,
                          *, n_tile=256, m_tile=512):
    """Runs both signs (bal, unbal) of the single attention head. Returns (x_bal, x_unbal).

    NOTE: like the torch code, f1 for row r is computed from embed_matrix[r] — this relies on the
    host-side bookkeeping placing the row nodes at unique-node indices 0..N-1 being valid (it always
    is: M_unique >= N_rows since self nodes are part of the unique set).
    """
    m_unique, fin = embed_matrix.shape
    n_signs, n_rows, _ = adj_stacked.shape
    assert n_signs == 2
    fout = w_stacked.shape[-1]

    # ---- host-side padding to TPU-friendly shapes (pure layout plumbing, zero-padded) ----
    fp = _round_up(fout, 64)                 # per-sign padded Fout; 2*fp is a multiple of 128 lanes
    fin_p = _round_up(fin, 128)
    nt = n_tile if n_rows >= n_tile else _round_up(n_rows, 8)
    mt = m_tile if m_unique >= m_tile else _round_up(m_unique, 128)
    n_pad = _round_up(n_rows, nt)
    m_pad = _round_up(max(m_unique, n_pad), mt)

    emb_p = jnp.zeros((m_pad, fin_p), jnp.float32).at[:m_unique, :fin].set(embed_matrix)

    # Fused projection weights: (Fin_p, 2*Fp) = [W_bal | W_unbal], zero padded.
    w_both = jnp.zeros((fin_p, 2 * fp), jnp.float32)
    w_both = w_both.at[:fin, :fout].set(w_stacked[0])
    w_both = w_both.at[:fin, fp:fp + fout].set(w_stacked[1])

    # Folded attention vectors: f1 = E @ (W@a1), f2 = E @ (W@a2) — removes the per-step row
    # projection matmul from the kernel.
    wa1 = jnp.zeros((fin_p, 2), jnp.float32)
    wa2 = jnp.zeros((fin_p, 2), jnp.float32)
    for s in range(2):
        wa1 = wa1.at[:fin, s].set(w_stacked[s] @ a_stacked[s, 0, :fout])
        wa2 = wa2.at[:fin, s].set(w_stacked[s] @ a_stacked[s, 0, fout:])

    # Adjacency counts (0/1/2) are exact in bf16 -> halve HBM traffic and VMEM tile footprint.
    adj_p = jnp.zeros((2, n_pad, m_pad), jnp.bfloat16)
    adj_p = adj_p.at[:, :n_rows, :m_unique].set(adj_stacked.astype(jnp.bfloat16))

    grid = (n_pad // nt, m_pad // mt)        # N tiles (parallel) x M tiles (reduction, last)

    out = pl.pallas_call(
        snea_gat_kernel,
        out_shape=jax.ShapeDtypeStruct((n_pad, 2 * fp), jnp.float32),
        grid=grid,
        in_specs=[
            pl.BlockSpec((nt, fin_p), lambda i, k: (i, 0)),        # embed rows (f1 source)
            pl.BlockSpec((mt, fin_p), lambda i, k: (k, 0)),        # embed cols (h / aggregation)
            pl.BlockSpec((fin_p, 2 * fp), lambda i, k: (0, 0)),    # [W_bal | W_unbal]
            pl.BlockSpec((fin_p, 2), lambda i, k: (0, 0)),         # folded W@a1
            pl.BlockSpec((fin_p, 2), lambda i, k: (0, 0)),         # folded W@a2
            pl.BlockSpec((2, nt, mt), lambda i, k: (0, i, k)),     # bf16 edge counts
        ],
        out_specs=pl.BlockSpec((nt, 2 * fp), lambda i, k: (i, 0)),
        scratch_shapes=[pltpu.VMEM((nt, 2 * fp), jnp.float32),     # running e@h (both signs)
                        pltpu.VMEM((nt, 2), jnp.float32)],         # running rowsum (both signs)
        compiler_params=pltpu.CompilerParams(
            dimension_semantics=("parallel", "arbitrary"),
            vmem_limit_bytes=32 * 1024 * 1024),
    )(emb_p, emb_p, w_both, wa1, wa2, adj_p)

    x_bal = out[:n_rows, :fout]
    x_unbal = out[:n_rows, fp:fp + fout]
    return x_bal, x_unbal


def _reference_head(embed, w, a, adj):
    """Plain-JAX reference of the same math (bf16 aggregation mirrored) for a sanity check."""
    fout = w.shape[-1]
    n_rows = adj.shape[0]
    h = embed @ w
    f1 = h @ a[0, :fout]
    f2 = h @ a[0, fout:]
    logits = f1[:n_rows, None] + f2[None, :]
    e = jnp.exp(-jnp.where(logits >= 0, logits, LEAKY_SLOPE * logits)) * adj
    rowsum = e.sum(axis=1, keepdims=True)
    hp = jnp.dot(e.astype(jnp.bfloat16), h.astype(jnp.bfloat16),
                 preferred_element_type=jnp.float32) / rowsum
    return jnp.where(hp > 0, hp, jnp.exp(hp) - 1.0)


if __name__ == "__main__":
    in_feat_dim, out_feat_dim = 64, 32     # module defaults
    num_total_nodes = 20

    # ---- host-side graph bookkeeping, exactly mirroring FirstLayerAggregator.forward ----
    nodes = list(range(8))
    to_neighs_pos = [{1, 2, 9}, {0, 3}, {5, 10, 11}, {2, 12},
                     {6, 13}, {4, 14, 7}, {5, 15}, {0, 16, 17}]
    to_neighs_neg = [{4, 18}, {5, 19}, {7, 9}, {6, 10},
                     {1, 11}, {0, 2}, {3, 12}, {13, 14}]
    samp_neighs_pos, samp_neighs_neg = to_neighs_pos, to_neighs_neg   # num_sample=None
    self_nodes = [set([nodes[i]]) for i in range(len(nodes))]          # only_layer=True

    unique_nodes_list = list(set.union(*samp_neighs_pos).union(*samp_neighs_neg).union(*self_nodes))
    unique_nodes = {n: i for i, n in enumerate(unique_nodes_list)}

    col_pos = [unique_nodes[n] for sn in samp_neighs_pos for n in sn]
    col_neg = [unique_nodes[n] for sn in samp_neighs_neg for n in sn]
    col_self = [unique_nodes[s] for ss in self_nodes for s in ss]
    row_pos = [i for i in range(len(samp_neighs_pos)) for _ in range(len(samp_neighs_pos[i]))]
    row_neg = [i for i in range(len(samp_neighs_neg)) for _ in range(len(samp_neighs_neg[i]))]
    row_self = [i for i in range(len(self_nodes)) for _ in range(len(self_nodes[i]))]

    n_rows = len(samp_neighs_pos)
    m_unique = len(unique_nodes)

    # Dense edge-COUNT matrices: equivalent to cat((adj_self, adj_*), dim=1) fed to sparse spmm.
    adj_bal = np.zeros((n_rows, m_unique), np.float32)
    adj_unbal = np.zeros((n_rows, m_unique), np.float32)
    for r, c in zip(row_self + row_pos, col_self + col_pos):
        adj_bal[r, c] += 1.0
    for r, c in zip(row_self + row_neg, col_self + col_neg):
        adj_unbal[r, c] += 1.0
    adj_stacked = jnp.asarray(np.stack([adj_bal, adj_unbal]))         # (2, N, M)

    # ---- deterministic parameter / feature init (xavier-normal style) ----
    key = jax.random.PRNGKey(0)
    kf, kw1, kw2, ka1, ka2 = jax.random.split(key, 5)
    feat_table = jax.random.normal(kf, (num_total_nodes, in_feat_dim), jnp.float32)
    w_scale = 1.414 * (2.0 / (in_feat_dim + out_feat_dim)) ** 0.5
    a_scale = 1.414 * (2.0 / (1 + 2 * out_feat_dim)) ** 0.5
    w_stacked = jnp.stack([w_scale * jax.random.normal(kw1, (in_feat_dim, out_feat_dim), jnp.float32),
                           w_scale * jax.random.normal(kw2, (in_feat_dim, out_feat_dim), jnp.float32)])
    a_stacked = jnp.stack([a_scale * jax.random.normal(ka1, (1, 2 * out_feat_dim), jnp.float32),
                           a_scale * jax.random.normal(ka2, (1, 2 * out_feat_dim), jnp.float32)])

    # embed_matrix = self.features(LongTensor(unique_nodes_list))  -> embedding gather (glue)
    embed_matrix = feat_table[jnp.asarray(unique_nodes_list, dtype=jnp.int32)]   # (M, in_feat)

    # ---- run the Pallas kernel ----
    x_bal, x_unbal = first_layer_aggregate(embed_matrix, w_stacked, a_stacked, adj_stacked)
    x_bal = jax.block_until_ready(x_bal)
    x_unbal = jax.block_until_ready(x_unbal)

    # ---- numerical check against a plain-JAX reference ----
    ref_bal = _reference_head(embed_matrix, w_stacked[0], a_stacked[0], adj_stacked[0])
    ref_unbal = _reference_head(embed_matrix, w_stacked[1], a_stacked[1], adj_stacked[1])
    assert x_bal.shape == (n_rows, out_feat_dim) and x_unbal.shape == (n_rows, out_feat_dim)
    assert jnp.allclose(x_bal, ref_bal, atol=2e-2, rtol=2e-2)
    assert jnp.allclose(x_unbal, ref_unbal, atol=2e-2, rtol=2e-2)
    assert not (jnp.any(jnp.isnan(x_bal)) or jnp.any(jnp.isnan(x_unbal)))

    print("KERNEL_OK")
</pallas_src>

<mosaic_0001>
module attributes {stable_mosaic.version = 11 : i64} {
  func.func @snea_gat_kernel(%arg0: i32, %arg1: i32, %arg2: memref<8x128xf32, #tpu.memory_space<vmem>>, %arg3: memref<128x128xf32, #tpu.memory_space<vmem>>, %arg4: memref<128x128xf32, #tpu.memory_space<vmem>>, %arg5: memref<128x2xf32, #tpu.memory_space<vmem>>, %arg6: memref<128x2xf32, #tpu.memory_space<vmem>>, %arg7: memref<2x8x128xbf16, #tpu.memory_space<vmem>>, %arg8: memref<8x128xf32, #tpu.memory_space<vmem>>, %arg9: memref<8x128xf32, #tpu.memory_space<vmem>>, %arg10: memref<8x2xf32, #tpu.memory_space<vmem>>) attributes {dimension_semantics = [#tpu.dimension_semantics<parallel>, #tpu.dimension_semantics<arbitrary>], iteration_bounds = array<i64: 1, 1>, scalar_prefetch = 0 : i64, scratch_operands = 2 : i64, tpu.core_type = #tpu.core_type<tc>, window_params = [{transform_indices = @transform_0, window_bounds = array<i64: 8, 128>}, {transform_indices = @transform_1, window_bounds = array<i64: 128, 128>}, {pipeline_mode = #tpu.pipeline_mode<synchronous>, transform_indices = @transform_2, window_bounds = array<i64: 128, 128>}, {pipeline_mode = #tpu.pipeline_mode<synchronous>, transform_indices = @transform_3, window_bounds = array<i64: 128, 2>}, {pipeline_mode = #tpu.pipeline_mode<synchronous>, transform_indices = @transform_4, window_bounds = array<i64: 128, 2>}, {transform_indices = @transform_5, window_bounds = array<i64: 2, 8, 128>}, {transform_indices = @transform_6, window_bounds = array<i64: 8, 128>}]} {
    %c0_i32 = arith.constant 0 : i32
    %0 = arith.cmpi eq, %arg1, %c0_i32 : i32
    %1 = arith.extui %0 : i1 to i32
    %c0_i32_0 = arith.constant 0 : i32
    %2 = arith.cmpi ne, %1, %c0_i32_0 : i32
    scf.if %2 {
      %cst_39 = arith.constant 0.000000e+00 : f32
      %69 = vector.broadcast %cst_39 : f32 to vector<8x128xf32>
      %c0_40 = arith.constant 0 : index
      %c0_41 = arith.constant 0 : index
      %70 = vector.load %arg9[%c0_40, %c0_41] : memref<8x128xf32, #tpu.memory_space<vmem>>, vector<8x128xf32>
      tpu.vector_store %arg9[%c0_40, %c0_41], %69 {strides = array<i32>} : memref<8x128xf32, #tpu.memory_space<vmem>>, vector<8x128xf32>,
      %cst_42 = arith.constant 0.000000e+00 : f32
      %71 = vector.broadcast %cst_42 : f32 to vector<8x2xf32>
      %c0_43 = arith.constant 0 : index
      %c0_44 = arith.constant 0 : index
      %72 = vector.load %arg10[%c0_43, %c0_44] : memref<8x2xf32, #tpu.memory_space<vmem>>, vector<8x2xf32>
      tpu.vector_store %arg10[%c0_43, %c0_44], %71 {strides = array<i32>} : memref<8x2xf32, #tpu.memory_space<vmem>>, vector<8x2xf32>,
    } else {
    }
    %c0 = arith.constant 0 : index
    %c0_1 = arith.constant 0 : index
    %3 = vector.load %arg3[%c0, %c0_1] : memref<128x128xf32, #tpu.memory_space<vmem>>, vector<128x128xf32>
    %c0_2 = arith.constant 0 : index
    %c0_3 = arith.constant 0 : index
    %4 = vector.load %arg4[%c0_2, %c0_3] : memref<128x128xf32, #tpu.memory_space<vmem>>, vector<128x128xf32>
    %cst = arith.constant dense<0.000000e+00> : vector<128x128xf32>
    %5 = tpu.matmul %3, %4, %cst {dimension_numbers = #tpu.dot_dimension_numbers<[1], [0], [0], [1], [0, 0, 1, 1], [], []>} : vector<128x128xf32>, vector<128x128xf32>, vector<128x128xf32> -> vector<128x128xf32>
    %c0_4 = arith.constant 0 : index
    %c0_5 = arith.constant 0 : index
    %6 = vector.load %arg2[%c0_4, %c0_5] : memref<8x128xf32, #tpu.memory_space<vmem>>, vector<8x128xf32>
    %c0_6 = arith.constant 0 : index
    %c0_7 = arith.constant 0 : index
    %7 = vector.load %arg5[%c0_6, %c0_7] : memref<128x2xf32, #tpu.memory_space<vmem>>, vector<128x2xf32>
    %cst_8 = arith.constant dense<0.000000e+00> : vector<8x2xf32>
    %8 = tpu.matmul %6, %7, %cst_8 {dimension_numbers = #tpu.dot_dimension_numbers<[1], [0], [0], [1], [0, 0, 1, 1], [], []>} : vector<8x128xf32>, vector<128x2xf32>, vector<8x2xf32> -> vector<8x2xf32>
    %c0_9 = arith.constant 0 : index
    %c0_10 = arith.constant 0 : index
    %9 = vector.load %arg6[%c0_9, %c0_10] : memref<128x2xf32, #tpu.memory_space<vmem>>, vector<128x2xf32>
    %c0_11 = arith.constant 0 : index
    %c0_12 = arith.constant 0 : index
    %10 = vector.load %arg3[%c0_11, %c0_12] : memref<128x128xf32, #tpu.memory_space<vmem>>, vector<128x128xf32>
    %cst_13 = arith.constant dense<0.000000e+00> : vector<2x128xf32>
    %11 = tpu.matmul %9, %10, %cst_13 {dimension_numbers = #tpu.dot_dimension_numbers<[0], [1], [1], [0], [0, 1, 1, 0], [], []>} : vector<128x2xf32>, vector<128x128xf32>, vector<2x128xf32> -> vector<2x128xf32>
    %12 = vector.extract_strided_slice %8 {offsets = [0, 0], sizes = [8, 1], strides = [1, 1]} : vector<8x2xf32> to vector<8x1xf32>
    %13 = vector.extract_strided_slice %11 {offsets = [0, 0], sizes = [1, 128], strides = [1, 1]} : vector<2x128xf32> to vector<1x128xf32>
    %14 = vector.broadcast %12 : vector<8x1xf32> to vector<8x128xf32>
    %15 = vector.broadcast %13 : vector<1x128xf32> to vector<8x128xf32>
    %16 = arith.addf %14, %15 : vector<8x128xf32>
    %cst_14 = arith.constant 0.000000e+00 : f32
    %17 = vector.broadcast %cst_14 : f32 to vector<8x128xf32>
    %18 = arith.cmpf oge, %16, %17 : vector<8x128xf32>
    %cst_15 = arith.constant 2.000000e-01 : f32
    %19 = vector.broadcast %cst_15 : f32 to vector<8x128xf32>
    %20 = arith.mulf %19, %16 : vector<8x128xf32>
    %21 = arith.select %18, %16, %20 : vector<8x128xi1>, vector<8x128xf32>
    %cst_16 = arith.constant 0.000000e+00 : f32
    %22 = vector.broadcast %cst_16 : f32 to vector<8x128xf32>
    %23 = arith.subf %22, %21 : vector<8x128xf32>
    %24 = math.exp %23 : vector<8x128xf32>
    %c0_17 = arith.constant 0 : index
    %c0_18 = arith.constant 0 : index
    %c0_19 = arith.constant 0 : index
    %25 = vector.load %arg7[%c0_17, %c0_18, %c0_19] : memref<2x8x128xbf16, #tpu.memory_space<vmem>>, vector<1x8x128xbf16>
    %26 = vector.shape_cast %25 : vector<1x8x128xbf16> to vector<8x128xbf16>
    %27 = arith.extf %26 : vector<8x128xbf16> to vector<8x128xf32>
    %28 = arith.mulf %24, %27 : vector<8x128xf32>
    %cst_20 = arith.constant dense<0.000000e+00> : vector<8xf32>
    %29 = vector.multi_reduction <add>, %28, %cst_20 [1] : vector<8x128xf32> to vector<8xf32>
    %30 = vector.shape_cast %29 : vector<8xf32> to vector<8x1xf32>
    %31 = vector.extract_strided_slice %5 {offsets = [0, 0], sizes = [128, 64], strides = [1, 1]} : vector<128x128xf32> to vector<128x64xf32>
    %32 = arith.truncf %28 : vector<8x128xf32> to vector<8x128xbf16>
    %33 = arith.truncf %31 : vector<128x64xf32> to vector<128x64xbf16>
    %cst_21 = arith.constant dense<0.000000e+00> : vector<8x64xf32>
    %34 = tpu.matmul %32, %33, %cst_21 {dimension_numbers = #tpu.dot_dimension_numbers<[1], [0], [0], [1], [0, 0, 1, 1], [], []>} : vector<8x128xbf16>, vector<128x64xbf16>, vector<8x64xf32> -> vector<8x64xf32>
    %35 = vector.extract_strided_slice %8 {offsets = [0, 1], sizes = [8, 1], strides = [1, 1]} : vector<8x2xf32> to vector<8x1xf32>
    %36 = vector.extract_strided_slice %11 {offsets = [1, 0], sizes = [1, 128], strides = [1, 1]} : vector<2x128xf32> to vector<1x128xf32>
    %37 = vector.broadcast %35 : vector<8x1xf32> to vector<8x128xf32>
    %38 = vector.broadcast %36 : vector<1x128xf32> to vector<8x128xf32>
    %39 = arith.addf %37, %38 : vector<8x128xf32>
    %cst_22 = arith.constant 0.000000e+00 : f32
    %40 = vector.broadcast %cst_22 : f32 to vector<8x128xf32>
    %41 = arith.cmpf oge, %39, %40 : vector<8x128xf32>
    %cst_23 = arith.constant 2.000000e-01 : f32
    %42 = vector.broadcast %cst_23 : f32 to vector<8x128xf32>
    %43 = arith.mulf %42, %39 : vector<8x128xf32>
    %44 = arith.select %41, %39, %43 : vector<8x128xi1>, vector<8x128xf32>
    %cst_24 = arith.constant 0.000000e+00 : f32
    %45 = vector.broadcast %cst_24 : f32 to vector<8x128xf32>
    %46 = arith.subf %45, %44 : vector<8x128xf32>
    %47 = math.exp %46 : vector<8x128xf32>
    %c1 = arith.constant 1 : index
    %c0_25 = arith.constant 0 : index
    %c0_26 = arith.constant 0 : index
    %48 = vector.load %arg7[%c1, %c0_25, %c0_26] : memref<2x8x128xbf16, #tpu.memory_space<vmem>>, vector<1x8x128xbf16>
    %49 = vector.shape_cast %48 : vector<1x8x128xbf16> to vector<8x128xbf16>
    %50 = arith.extf %49 : vector<8x128xbf16> to vector<8x128xf32>
    %51 = arith.mulf %47, %50 : vector<8x128xf32>
    %cst_27 = arith.constant dense<0.000000e+00> : vector<8xf32>
    %52 = vector.multi_reduction <add>, %51, %cst_27 [1] : vector<8x128xf32> to vector<8xf32>
    %53 = vector.shape_cast %52 : vector<8xf32> to vector<8x1xf32>
    %54 = vector.extract_strided_slice %5 {offsets = [0, 64], sizes = [128, 64], strides = [1, 1]} : vector<128x128xf32> to vector<128x64xf32>
    %55 = arith.truncf %51 : vector<8x128xf32> to vector<8x128xbf16>
    %56 = arith.truncf %54 : vector<128x64xf32> to vector<128x64xbf16>
    %cst_28 = arith.constant dense<0.000000e+00> : vector<8x64xf32>
    %57 = tpu.matmul %55, %56, %cst_28 {dimension_numbers = #tpu.dot_dimension_numbers<[1], [0], [0], [1], [0, 0, 1, 1], [], []>} : vector<8x128xbf16>, vector<128x64xbf16>, vector<8x64xf32> -> vector<8x64xf32>
    %c0_29 = arith.constant 0 : index
    %c0_30 = arith.constant 0 : index
    %58 = vector.load %arg9[%c0_29, %c0_30] : memref<8x128xf32, #tpu.memory_space<vmem>>, vector<8x128xf32>
    %59 = tpu.concatenate %34, %57 in 1 : vector<8x64xf32>, vector<8x64xf32> -> vector<8x128xf32>
    %60 = arith.addf %58, %59 : vector<8x128xf32>
    %c0_31 = arith.constant 0 : index
    %c0_32 = arith.constant 0 : index
    %61 = vector.load %arg9[%c0_31, %c0_32] : memref<8x128xf32, #tpu.memory_space<vmem>>, vector<8x128xf32>
    tpu.vector_store %arg9[%c0_31, %c0_32], %60 {strides = array<i32>} : memref<8x128xf32, #tpu.memory_space<vmem>>, vector<8x128xf32>,
    %c0_33 = arith.constant 0 : index
    %c0_34 = arith.constant 0 : index
    %62 = vector.load %arg10[%c0_33, %c0_34] : memref<8x2xf32, #tpu.memory_space<vmem>>, vector<8x2xf32>
    %63 = tpu.concatenate %30, %53 in 1 : vector<8x1xf32>, vector<8x1xf32> -> vector<8x2xf32>
    %64 = arith.addf %62, %63 : vector<8x2xf32>
    %c0_35 = arith.constant 0 : index
    %c0_36 = arith.constant 0 : index
    %65 = vector.load %arg10[%c0_35, %c0_36] : memref<8x2xf32, #tpu.memory_space<vmem>>, vector<8x2xf32>
    tpu.vector_store %arg10[%c0_35, %c0_36], %64 {strides = array<i32>} : memref<8x2xf32, #tpu.memory_space<vmem>>, vector<8x2xf32>,
    %c0_i32_37 = arith.constant 0 : i32
    %66 = arith.cmpi eq, %arg1, %c0_i32_37 : i32
    %67 = arith.extui %66 : i1 to i32
    %c0_i32_38 = arith.constant 0 : i32
    %68 = arith.cmpi ne, %67, %c0_i32_38 : i32
    scf.if %68 {
      %c0_39 = arith.constant 0 : index
      %c0_40 = arith.constant 0 : index
      %69 = vector.load %arg10[%c0_39, %c0_40] : memref<8x2xf32, #tpu.memory_space<vmem>>, vector<8x2xf32>
      %cst_41 = arith.constant 0.000000e+00 : f32
      %70 = vector.broadcast %cst_41 : f32 to vector<8x2xf32>
      %71 = arith.cmpf ogt, %69, %70 : vector<8x2xf32>
      %cst_42 = arith.constant 1.000000e+00 : f32
      %72 = vector.broadcast %cst_42 : f32 to vector<8x2xf32>
      %73 = arith.select %71, %69, %72 : vector<8x2xi1>, vector<8x2xf32>
      %74 = tpu.reciprocal %73 {approx = true} : vector<8x2xf32> -> vector<8x2xf32>
      %c0_43 = arith.constant 0 : index
      %c0_44 = arith.constant 0 : index
      %75 = vector.load %arg9[%c0_43, %c0_44] : memref<8x128xf32, #tpu.memory_space<vmem>>, vector<8x128xf32>
      %76 = vector.extract_strided_slice %75 {offsets = [0, 0], sizes = [8, 64], strides = [1, 1]} : vector<8x128xf32> to vector<8x64xf32>
      %77 = vector.extract_strided_slice %74 {offsets = [0, 0], sizes = [8, 1], strides = [1, 1]} : vector<8x2xf32> to vector<8x1xf32>
      %78 = vector.broadcast %77 : vector<8x1xf32> to vector<8x64xf32>
      %79 = arith.mulf %76, %78 : vector<8x64xf32>
      %80 = vector.extract_strided_slice %75 {offsets = [0, 64], sizes = [8, 64], strides = [1, 1]} : vector<8x128xf32> to vector<8x64xf32>
      %81 = vector.extract_strided_slice %74 {offsets = [0, 1], sizes = [8, 1], strides = [1, 1]} : vector<8x2xf32> to vector<8x1xf32>
      %82 = vector.broadcast %81 : vector<8x1xf32> to vector<8x64xf32>
      %83 = arith.mulf %80, %82 : vector<8x64xf32>
      %84 = tpu.concatenate %79, %83 in 1 : vector<8x64xf32>, vector<8x64xf32> -> vector<8x128xf32>
      %cst_45 = arith.constant 0.000000e+00 : f32
      %85 = vector.broadcast %cst_45 : f32 to vector<8x128xf32>
      %86 = arith.cmpf ogt, %84, %85 : vector<8x128xf32>
      %87 = math.exp %84 : vector<8x128xf32>
      %cst_46 = arith.constant 1.000000e+00 : f32
      %88 = vector.broadcast %cst_46 : f32 to vector<8x128xf32>
      %89 = arith.subf %87, %88 : vector<8x128xf32>
      %90 = arith.select %86, %84, %89 : vector<8x128xi1>, vector<8x128xf32>
      %c0_47 = arith.constant 0 : index
      %c0_48 = arith.constant 0 : index
      %91 = vector.load %arg8[%c0_47, %c0_48] : memref<8x128xf32, #tpu.memory_space<vmem>>, vector<8x128xf32>
      tpu.vector_store %arg8[%c0_47, %c0_48], %90 {strides = array<i32>} : memref<8x128xf32, #tpu.memory_space<vmem>>, vector<8x128xf32>,
    } else {
    }
    return
  }
  func.func @transform_0(%arg0: i32, %arg1: i32) -> (i32, i32) {
    %c0_i32 = arith.constant 0 : i32
    %c0_i32_0 = arith.constant 0 : i32
    return %arg0, %c0_i32 : i32, i32
  }
  func.func @transform_1(%arg0: i32, %arg1: i32) -> (i32, i32) {
    %c0_i32 = arith.constant 0 : i32
    %c0_i32_0 = arith.constant 0 : i32
    return %arg1, %c0_i32 : i32, i32
  }
  func.func @transform_2(%arg0: i32, %arg1: i32) -> (i32, i32) {
    %c0_i32 = arith.constant 0 : i32
    %c0_i32_0 = arith.constant 0 : i32
    %c0_i32_1 = arith.constant 0 : i32
    return %c0_i32, %c0_i32_0 : i32, i32
  }
  func.func @transform_3(%arg0: i32, %arg1: i32) -> (i32, i32) {
    %c0_i32 = arith.constant 0 : i32
    %c0_i32_0 = arith.constant 0 : i32
    %c0_i32_1 = arith.constant 0 : i32
    return %c0_i32, %c0_i32_0 : i32, i32
  }
  func.func @transform_4(%arg0: i32, %arg1: i32) -> (i32, i32) {
    %c0_i32 = arith.constant 0 : i32
    %c0_i32_0 = arith.constant 0 : i32
    %c0_i32_1 = arith.constant 0 : i32
    return %c0_i32, %c0_i32_0 : i32, i32
  }
  func.func @transform_5(%arg0: i32, %arg1: i32) -> (i32, i32, i32) {
    %c0_i32 = arith.constant 0 : i32
    %c0_i32_0 = arith.constant 0 : i32
    return %c0_i32, %arg0, %arg1 : i32, i32, i32
  }
  func.func @transform_6(%arg0: i32, %arg1: i32) -> (i32, i32) {
    %c0_i32 = arith.constant 0 : i32
    %c0_i32_0 = arith.constant 0 : i32
    return %arg0, %c0_i32 : i32, i32
  }
}

</mosaic_0001>

<bundles_post_ra>
// kernel: tpu_custom_call.1
= control target key start
LH: loop header
LB: loop body
LE: loop exit
PB: predicated region body
PF: predicated region fallthrough
CT: control target
= control target key end

     0   :  { %11 = vsyncpa [#allocation5], 0  ;;  %s784_s0 = inlined_call_operand.vmem [shape: f32[128,128], index: 0, kind: input, shape index: {}]   ;;  %s785_s1 = inlined_call_operand.vmem [shape: f32[128,128], index: 1, kind: input, shape index: {}]   ;;  %s786_s2 = inlined_call_operand.hbm [shape: f32[128,128], index: 2, kind: input, shape index: {}]   ;;  %s787_s3 = inlined_call_operand.vmem [shape: f32[128,2], index: 3, kind: input, shape index: {}]   ;;  %s788_s4 = inlined_call_operand.vmem [shape: f32[128,2], index: 4, kind: input, shape index: {}]   ;;  %s789_s5 = inlined_call_operand.hbm [shape: bf16[2,8,128], index: 5, kind: input, shape index: {}]   ;;  %s790_s6 = inlined_call_operand.hbm [shape: f32[8,128], index: 6, kind: output, shape index: {}]  }
   0x1   :  { %12 = vsyncpa [#allocation8], 0 }
   0x2   :  { %13 = vsyncpa [#allocation6], 0  ;;  %s22_s23 = sshll.u32 %s786_s2, 4  ;;  %s565_s24 = smov [#allocation4]   ;;  %s23_s23 = int_to_ptr.hbm [resolvable:$true] %s22_s23 }
   0x3   :  { %s24_s25 = sshll.u32 %s565_s24, 4  ;;  %s39_s28 = sshll.u32 %s789_s5, 4  ;;  %s25_s25 = int_to_ptr.vmem [resolvable:$true] %s24_s25  ;;  %s40_s28 = int_to_ptr.hbm [resolvable:$true] %s39_s28 }
   0x4   :  { %s566_s29 = smov 128   ;;  %s567_s30 = smov 8  }
   0x5   :  { %30 = dma.hbm_to_vmem [thread:$0]  %s23_s23, 2048, %s25_s25, [#allocation5], %s566_s29, %s566_s29, %s567_s30  }
   0x6   :  { %s568_s7 = smov [#allocation7]   ;;  %s569_s9 = smov 64  }
   0x7   :  { %s41_s8 = sshll.u32 %s568_s7, 4  ;;  %s570_s10 = smov 4   ;;  %s42_s8 = int_to_ptr.vmem [resolvable:$true] %s41_s8 }
   0x8   :  { %47 = dma.hbm_to_vmem [thread:$0]  %s40_s28, 128, %s42_s8, [#allocation8], %s569_s9, %s569_s9, %s570_s10  }
   0x9   :  { %559 = dma.done.wait [#allocation5], 2048  }
   0xa   :  { %560 = vsyncadd [#allocation5], 4294965248 }
   0xb   :  { %561 = dma.done.wait [#allocation8], 128  }
   0xc   :  { %562 = vsyncadd [#allocation8], 4294967168  ;;  %v94_v0 = vld [vmem:[#allocation4 + $0x78] sm:$0xff]  ;;  %v93_v1 = vld [vmem:[#allocation4 + $0x70] sm:$0xff]  ;;  %vm61_vm2 = vcmask 15360   ;;  %vm379_vm3 = vcmask 7168  }
   0xd   :  { %95 = vmatpush.msra.mxu0 %v94_v0  ;;  %429 = vmatpush.msra.mxu2 %v94_v0  ;;  %v92_v2 = vld [vmem:[#allocation4 + $0x68] sm:$0xff]  ;;  %v91_v3 = vld [vmem:[#allocation4 + $0x60] sm:$0xff]  ;;  %v90_v4 = vld [vmem:[#allocation4 + $0x58] sm:$0xff]  ;;  %vm374_vm5 = vcmask 523264   ;;  %s417_s30 = sshll.u32 %s790_s6, 4  ;;  %s418_s30 = int_to_ptr.hbm [resolvable:$true] %s417_s30 }
   0xe   :  { %v89_v5 = vld [vmem:[#allocation4 + $0x50] sm:$0xff]  ;;  %v88_v6 = vld [vmem:[#allocation4 + $0x48] sm:$0xff]  ;;  %v87_v7 = vld [vmem:[#allocation4 + $0x40] sm:$0xff] }
   0xf   :  { %96 = vmatpush.msra.mxu0 %v93_v1  ;;  %430 = vmatpush.msra.mxu2 %v93_v1  ;;  %v86_v8 = vld [vmem:[#allocation4 + $0x38] sm:$0xff]  ;;  %v85_v9 = vld [vmem:[#allocation4 + $0x30] sm:$0xff]  ;;  %v175_v11 = vld [vmem:[%s787_s3 + $0x70] sm:$0xff] }
  0x10   :  { %v176_v10 = vld [vmem:[%s787_s3 + $0x78] sm:$0xff]  ;;  %v84_v12 = vld [vmem:[#allocation4 + $0x28] sm:$0xff]  ;;  %v174_v13 = vld [vmem:[%s787_s3 + $0x68] sm:$0xff] }
  0x11   :  { %97 = vmatpush.msra.mxu0 %v92_v2  ;;  %431 = vmatpush.msra.mxu2 %v92_v2  ;;  %v83_v14 = vld [vmem:[#allocation4 + $0x20] sm:$0xff]  ;;  %v173_v15 = vld [vmem:[%s787_s3 + $0x60] sm:$0xff]  ;;  %v81_v17 = vld [vmem:[#allocation4 + $0x10] sm:$0xff] }
  0x12   :  { %177 = vmatpush.msra.mxu1 %v176_v10  ;;  %v82_v16 = vld [vmem:[#allocation4 + $0x18] sm:$0xff]  ;;  %v172_v18 = vld [vmem:[%s787_s3 + $0x58] sm:$0xff]  ;;  %v171_v19 = vld [vmem:[%s787_s3 + $0x50] sm:$0xff] }
  0x13   :  { %98 = vmatpush.msra.mxu0 %v91_v3  ;;  %432 = vmatpush.msra.mxu2 %v91_v3  ;;  %v80_v20 = vld [vmem:[#allocation4 + $0x8] sm:$0xff]  ;;  %v170_v21 = vld [vmem:[%s787_s3 + $0x48] sm:$0xff]  ;;  %v643_v23 = vld [vmem:[%s785_s1] sm:$0xff] }
  0x14   :  { %178 = vmatpush.msra.mxu1 %v175_v11  ;;  %v79_v22 = vld [vmem:[#allocation4] sm:$0xff]  ;;  %v71_v24 = vld [vmem:[%s785_s1 + $0x40] sm:$0xff]  ;;  %v168_v26 = vld [vmem:[%s787_s3 + $0x38] sm:$0xff] }
  0x15   :  { %99 = vmatpush.msra.mxu0 %v90_v4  ;;  %433 = vmatpush.msra.mxu2 %v90_v4  ;;  %v169_v25 = vld [vmem:[%s787_s3 + $0x40] sm:$0xff]  ;;  %v167_v27 = vld [vmem:[%s787_s3 + $0x30] sm:$0xff]  ;;  %v166_v28 = vld [vmem:[%s787_s3 + $0x28] sm:$0xff] }
  0x16   :  { %179 = vmatpush.msra.mxu1 %v174_v13  ;;  %v64_v29 = vld [vmem:[%s785_s1 + $0x8] sm:$0xff]  ;;  %v165_v31 = vld [vmem:[%s787_s3 + $0x20] sm:$0xff]  ;;  %v164_v32 = vld [vmem:[%s787_s3 + $0x18] sm:$0xff] }
  0x17   :  { %100 = vmatpush.msra.mxu0 %v89_v5  ;;  %434 = vmatpush.msra.mxu2 %v89_v5  ;;  %v72_v30 = vld [vmem:[%s785_s1 + $0x48] sm:$0xff]  ;;  %v163_v33 = vld [vmem:[%s787_s3 + $0x10] sm:$0xff]  ;;  %v161_v37 = vld [vmem:[%s787_s3] sm:$0xff] }
  0x18   :  { %180 = vmatpush.msra.mxu1 %v173_v15  ;;  %v162_v34 = vld [vmem:[%s787_s3 + $0x8] sm:$0xff]  ;;  %v65_v35 = vld [vmem:[%s785_s1 + $0x10] sm:$0xff]  ;;  %v160_v38 = vld [vmem:[%s784_s0] sm:$0xff] }
  0x19   :  { %101 = vmatpush.msra.mxu0 %v88_v6  ;;  %435 = vmatpush.msra.mxu2 %v88_v6  ;;  %v73_v36 = vld [vmem:[%s785_s1 + $0x50] sm:$0xff]  ;;  %v66_v39 = vld [vmem:[%s785_s1 + $0x18] sm:$0xff]  ;;  %v67_v44 = vld [vmem:[%s785_s1 + $0x20] sm:$0xff] }
  0x1a   :  { %181 = vmatpush.msra.mxu1 %v172_v18  ;;  %v74_v40 = vld [vmem:[%s785_s1 + $0x58] sm:$0xff]  ;;  %v211_v42 = vld [vmem:[%s788_s4 + $0x70] sm:$0xff]  ;;  %v75_v45 = vld [vmem:[%s785_s1 + $0x60] sm:$0xff] }
  0x1b   :  { %102 = vmatpush.msra.mxu0 %v87_v7  ;;  %436 = vmatpush.msra.mxu2 %v87_v7  ;;  %v212_v41 = vld [vmem:[%s788_s4 + $0x78] sm:$0xff]  ;;  %v77_v46 = vld [vmem:[%s785_s1 + $0x70] sm:$0xff]  ;;  %v76_v47 = vld [vmem:[%s785_s1 + $0x68] sm:$0xff]  ;;  %v571_v7 = vmov 1  }
  0x1c   :  { %182 = vmatpush.msra.mxu1 %v171_v19  ;;  %v78_v43 = vld [vmem:[%s785_s1 + $0x78] sm:$0xff]  ;;  %v68_v48 = vld [vmem:[%s785_s1 + $0x28] sm:$0xff]  ;;  %v69_v49 = vld [vmem:[%s785_s1 + $0x30] sm:$0xff]  ;;  %476 = vset.pattern.permute.xlu1 %v571_v7 }
  0x1d   :  { %103 = vmatpush.msra.mxu0 %v86_v8  ;;  %437 = vmatpush.msra.mxu2 %v86_v8  ;;  %v70_v50 = vld [vmem:[%s785_s1 + $0x38] sm:$0xff]  ;;  %v210_v51 = vld [vmem:[%s788_s4 + $0x68] sm:$0xff]  ;;  %v209_v52 = vld [vmem:[%s788_s4 + $0x60] sm:$0xff] }
  0x1e   :  { %183 = vmatpush.msra.mxu1 %v170_v21  ;;  %v208_v53 = vld [vmem:[%s788_s4 + $0x58] sm:$0xff]  ;;  %v207_v54 = vld [vmem:[%s788_s4 + $0x50] sm:$0xff]  ;;  %v206_v55 = vld [vmem:[%s788_s4 + $0x48] sm:$0xff] }
  0x1f   :  { %104 = vmatpush.msra.mxu0 %v85_v9  ;;  %438 = vmatpush.msra.mxu2 %v85_v9  ;;  %v205_v56 = vld [vmem:[%s788_s4 + $0x40] sm:$0xff]  ;;  %v204_v57 = vld [vmem:[%s788_s4 + $0x38] sm:$0xff]  ;;  %v203_v58 = vld [vmem:[%s788_s4 + $0x30] sm:$0xff] }
  0x20   :  { %184 = vmatpush.msra.mxu1 %v169_v25  ;;  %v202_v59 = vld [vmem:[%s788_s4 + $0x28] sm:$0xff]  ;;  %v201_v60 = vld [vmem:[%s788_s4 + $0x20] sm:$0xff]  ;;  %v200_v61 = vld [vmem:[%s788_s4 + $0x18] sm:$0xff] }
  0x21   :  { %105 = vmatpush.msra.mxu0 %v84_v12  ;;  %439 = vmatpush.msra.mxu2 %v84_v12  ;;  %v199_v62 = vld [vmem:[%s788_s4 + $0x10] sm:$0xff]  ;;  %v198_v63 = vld [vmem:[%s788_s4 + $0x8] sm:$0xff]  ;;  %v197_v0 = vld [vmem:[%s788_s4] sm:$0xff]  ;;  %s574_s4 = smov [#allocation9]  }
  0x22   :  { %185 = vmatpush.msra.mxu1 %v168_v26  ;;  %s415_s27 = sshll.u32 %s574_s4, 4  ;;  %s416_s27 = int_to_ptr.vmem [resolvable:$true] %s415_s27 }
  0x23   :  { %106 = vmatpush.msra.mxu0 %v83_v14  ;;  %440 = vmatpush.msra.mxu2 %v83_v14 }
  0x24   :  { %186 = vmatpush.msra.mxu1 %v167_v27 }
  0x25   :  { %107 = vmatpush.msra.mxu0 %v82_v16  ;;  %441 = vmatpush.msra.mxu2 %v82_v16 }
  0x26   :  { %187 = vmatpush.msra.mxu1 %v166_v28 }
  0x27   :  { %108 = vmatpush.msra.mxu0 %v81_v17  ;;  %442 = vmatpush.msra.mxu2 %v81_v17 }
  0x28   :  { %188 = vmatpush.msra.mxu1 %v165_v31 }
  0x29   :  { %109 = vmatpush.msra.mxu0 %v80_v20  ;;  %443 = vmatpush.msra.mxu2 %v80_v20  ;;  %v572_v20 = vmov 0  }
  0x2a   :  { %189 = vmatpush.msra.mxu1 %v164_v32  ;;  %477 = vset.pattern.permute.xlu0 %v572_v20 }
  0x2b   :  { %110 = vmatpush.msra.mxu0 %v79_v22  ;;  %444 = vmatpush.msra.mxu2 %v79_v22 }
  0x2c   :  { %111 = vmatmul.f32.vlgmr.msra.gmra.mxu0 %v643_v23  ;;  %135 = vmatmul.f32.vlgmr.msra.gmra.mxu2 %v71_v24 }
  0x2d   :  { %190 = vmatpush.msra.mxu1 %v163_v33  ;;  %448 = vmatpush.lsf.msrb.mxu2 %v212_v41 }
  0x2f   :  { %191 = vmatpush.msra.mxu1 %v162_v34  ;;  %245 = vmatpush.xpose.msra.mxu2 %v78_v43 }
  0x31   :  { %192 = vmatpush.msra.mxu1 %v161_v37  ;;  %v318_v37 = vld [vmem:[#allocation7] sm:$0xff]  }
  0x32   :  { %193 = vmatmul.f32.vlgmr.msra.gmra.mxu1 %v160_v38  ;;  %v319_v38 = vunpack.c.h.bf16 %v318_v37 }
  0x33   :  { %449 = vmatpush.lsf.msrb.mxu2 %v211_v42 }
  0x34   :  { %114 = vmatmul.f32.gmra.mxu0 %v64_v29  ;;  %138 = vmatmul.f32.gmra.mxu2 %v72_v30 }
  0x35   :  { %246 = vmatpush.xpose.msra.mxu2 %v77_v46 }
  0x39   :  { %247 = vmatpush.xpose.msra.mxu2 %v76_v47 }
  0x3c   :  { %117 = vmatmul.f32.gmra.mxu0 %v65_v35  ;;  %141 = vmatmul.f32.gmra.mxu2 %v73_v36 }
  0x3d   :  { %248 = vmatpush.xpose.msra.mxu2 %v75_v45 }
  0x41   :  { %249 = vmatpush.xpose.msra.mxu2 %v74_v40 }
  0x44   :  { %120 = vmatmul.f32.gmra.mxu0 %v66_v39  ;;  %144 = vmatmul.f32.gmra.mxu2 %v74_v40 }
  0x45   :  { %250 = vmatpush.xpose.msra.mxu2 %v73_v36 }
  0x49   :  { %251 = vmatpush.xpose.msra.mxu2 %v72_v30 }
  0x4c   :  { %123 = vmatmul.f32.gmra.mxu0 %v67_v44  ;;  %147 = vmatmul.f32.gmra.mxu2 %v75_v45 }
  0x4d   :  { %252 = vmatpush.xpose.msra.mxu2 %v71_v24 }
  0x51   :  { %253 = vmatpush.xpose.msra.mxu2 %v70_v50 }
  0x54   :  { %126 = vmatmul.f32.gmra.mxu0 %v68_v48  ;;  %150 = vmatmul.f32.gmra.mxu2 %v76_v47 }
  0x55   :  { %254 = vmatpush.xpose.msra.mxu2 %v69_v49 }
  0x59   :  { %255 = vmatpush.xpose.msra.mxu2 %v68_v48 }
  0x5c   :  { %129 = vmatmul.f32.gmra.mxu0 %v69_v49  ;;  %153 = vmatmul.f32.gmra.mxu2 %v77_v46 }
  0x5d   :  { %256 = vmatpush.xpose.msra.mxu2 %v67_v44 }
  0x61   :  { %257 = vmatpush.xpose.msra.mxu2 %v66_v39 }
  0x64   :  { %132 = vmatmul.f32.gmra.mxu0 %v70_v50  ;;  %156 = vmatmul.f32.gmra.mxu2 %v78_v43 }
  0x65   :  { %258 = vmatpush.xpose.msra.mxu2 %v65_v35 }
  0x69   :  { %259 = vmatpush.xpose.msra.mxu2 %v64_v29 }
  0x6d   :  { %260 = vmatpush.xpose.msra.mxu2 %v643_v23 }
  0x71   :  { %450 = vmatpush.lsf.msrb.mxu2 %v210_v51 }
  0x73   :  { %451 = vmatpush.lsf.msrb.mxu2 %v209_v52 }
  0x75   :  { %452 = vmatpush.lsf.msrb.mxu2 %v208_v53 }
  0x77   :  { %453 = vmatpush.lsf.msrb.mxu2 %v207_v54 }
  0x79   :  { %454 = vmatpush.lsf.msrb.mxu2 %v206_v55 }
  0x7b   :  { %455 = vmatpush.lsf.msrb.mxu2 %v205_v56  ;;  %v279_v56 = vunpack.c.l.bf16 %v318_v37 }
  0x7d   :  { %456 = vmatpush.lsf.msrb.mxu2 %v204_v57 }
  0x7f   :  { %457 = vmatpush.lsf.msrb.mxu2 %v203_v58 }
  0x81   :  { %458 = vmatpush.lsf.msrb.mxu2 %v202_v59 }
  0x83   :  { %459 = vmatpush.lsf.msrb.mxu2 %v201_v60  ;;  %v573_v60 = vmov 0.0  }
  0x84   :  { %62 = vst.msk [vmem:[#allocation3] sm:$0xff] %vm61_vm2, %v573_v60 }
  0x85   :  { %460 = vmatpush.lsf.msrb.mxu2 %v200_v61 }
  0x87   :  { %461 = vmatpush.lsf.msrb.mxu2 %v199_v62 }
  0x89   :  { %462 = vmatpush.lsf.msrb.mxu2 %v198_v63 }
  0x8b   :  { %463 = vmatpush.lsf.msrb.mxu2 %v197_v0  ;;  %v378_v61 = vld [vmem:[#allocation3] sm:$0xff] }
  0x8c   :  { %464 = vllmr.1.mxu2 }
  0xa9   :  { %v112_v1 = vpop.f32.mrf.mxu0 }
  0xad   :  { %465 = vmatmul.lmr.bf16.vlgmr.msra.gmra.1.mxu2 }
  0xaf   :  { %v136_v2 = vpop.f32.mrf.mxu2  ;;  %v194_v14 = vpop.f32.mrf.mxu1 }
  0xb1   :  { %v115_v3 = vpop.f32.mrf.mxu0 }
  0xb2   :  { %v284_v25 = vpack.c.bf16 %v115_v3, %v112_v1 }
  0xb7   :  { %v139_v4 = vpop.f32.mrf.mxu2 }
  0xb8   :  { %v288_v5 = vpack.c.bf16 %v139_v4, %v136_v2 }
  0xb9   :  { %v118_v6 = vpop.f32.mrf.mxu0 }
  0xba   :  { %340 = vrot.lane.b32.xlu2 %v288_v5, %s569_s9 }
  0xbf   :  { %v142_v8 = vpop.f32.mrf.mxu2 }
  0xc1   :  { %v121_v9 = vpop.f32.mrf.mxu0 }
  0xc2   :  { %v285_v16 = vpack.c.bf16 %v121_v9, %v118_v6 }
  0xc7   :  { %v145_v10 = vpop.f32.mrf.mxu2 }
  0xc8   :  { %v289_v11 = vpack.c.bf16 %v145_v10, %v142_v8 }
  0xc9   :  { %v124_v12 = vpop.f32.mrf.mxu0 }
  0xca   :  { %342 = vrot.lane.b32.xlu1 %v289_v11, %s569_s9 }
  0xcf   :  { %v148_v13 = vpop.f32.mrf.mxu2 }
  0xd1   :  { %v127_v15 = vpop.f32.mrf.mxu0 }
  0xd2   :  { %306 = vperm.xlu1 %476, %v194_v14   ;;  %v286_v27 = vpack.c.bf16 %v127_v15, %v124_v12 }
  0xd7   :  { %v151_v17 = vpop.f32.mrf.mxu2 }
  0xd8   :  { %v290_v26 = vpack.c.bf16 %v151_v17, %v148_v13 }
  0xd9   :  { %v130_v18 = vpop.f32.mrf.mxu0 }
  0xda   :  { %334 = vrot.lane.b32.xlu1 %v285_v16, %s569_s9 }
  0xdf   :  { %v154_v19 = vpop.f32.mrf.mxu2 }
  0xe1   :  { %v133_v21 = vpop.f32.mrf.mxu0 }
  0xe2   :  { %v287_v22 = vpack.c.bf16 %v133_v21, %v130_v18 }
  0xe4   :  { %338 = vrot.lane.b32.xlu2 %v287_v22, %s569_s9 }
  0xe7   :  { %v157_v23 = vpop.f32.mrf.mxu2 }
  0xe8   :  { %v291_v24 = vpack.c.bf16 %v157_v23, %v154_v19 }
  0xea   :  { %346 = vrot.lane.b32.xlu0 %v291_v24, %s569_s9  ;;  %292 = vmatpush.bf16.msra.mxu3 %v291_v24 }
  0xec   :  { %332 = vrot.lane.b32.xlu2 %v284_v25, %s569_s9 }
  0xee   :  { %293 = vmatpush.bf16.msra.mxu3 %v290_v26 }
  0xf2   :  { %344 = vrot.lane.b32.xlu0 %v290_v26, %s569_s9  ;;  %294 = vmatpush.bf16.msra.mxu3 %v289_v11 }
  0xf6   :  { %295 = vmatpush.bf16.msra.mxu3 %v288_v5 }
  0xfa   :  { %336 = vrot.lane.b32.xlu0 %v286_v27, %s569_s9  ;;  %296 = vmatpush.bf16.msra.mxu3 %v287_v22 }
  0xfe   :  { %297 = vmatpush.bf16.msra.mxu3 %v286_v27 }
 0x102   :  { %267 = vperm.xlu0 %477, %v194_v14   ;;  %298 = vmatpush.bf16.msra.mxu3 %v285_v16 }
 0x106   :  { %299 = vmatpush.bf16.msra.mxu3 %v284_v25 }
 0x114   :  { %v341_v43 = vpop.permute.xlu2 %340 }
 0x130   :  { %v262_v29 = vpop.f32.mrf.mxu2 }
 0x131   :  { %v309_v30 = vperm.slane %v262_v29, 1  ;;  %v270_v46 = vperm.slane %v262_v29, 0 }
 0x13c   :  { %v343_v28 = vpop.permute.xlu1 %342 }
 0x13e   :  { %v339_v45 = vpop.permute.xlu2 %338 }
 0x144   :  { %v307_v31 = vpop.permute.xlu1 %306 }
 0x145   :  { %v310_v32 = vadd.f32 %v309_v30, %v307_v31 }
 0x146   :  { %v333_v53 = vpop.permute.xlu2 %332 }
 0x147   :  { %vm311_vm0 = vcmp.ge.f32.partialorder %v310_v32, 0.0  ;;  %v312_v33 = vmul.f32 0.2, %v310_v32 }
 0x149   :  { %v313_v34 = vsel %vm311_vm0, %v310_v32, %v312_v33 }
 0x14a   :  { %v314_v35 = vsub.f32 0.0, %v313_v34 }
 0x14c   :  { %v315_v36 = vmul.f32 1.442695, %v314_v35  ;;  %v335_v50 = vpop.permute.xlu1 %334 }
 0x14e   :  { %479 = vpow2.f32 %v315_v36 }
 0x154   :  { %v480_v39 = vpop.eup %479 }
 0x155   :  { %v320_v41 = vmul.f32 %v480_v39, %v319_v38 }
 0x157   :  { %321 = vadd.xlane.f32.xlu2 %v320_v41  ;;  %v323_v55 = vpack.c.bf16 %v320_v41, %v320_v41 }
 0x15c   :  { %v347_v40 = vpop.permute.xlu0 %346 }
 0x15d   :  { %356 = vmatpush.bf16.msrb.mxu1 %v347_v40 }
 0x164   :  { %v345_v42 = vpop.permute.xlu0 %344 }
 0x165   :  { %357 = vmatpush.bf16.msrb.mxu1 %v345_v42 }
 0x169   :  { %358 = vmatpush.bf16.msrb.mxu1 %v343_v28 }
 0x16c   :  { %v337_v44 = vpop.permute.xlu0 %336 }
 0x16d   :  { %359 = vmatpush.bf16.msrb.mxu1 %v341_v43 }
 0x171   :  { %360 = vmatpush.bf16.msrb.mxu1 %v339_v45 }
 0x174   :  { %v268_v47 = vpop.permute.xlu0 %267 }
 0x175   :  { %v271_v48 = vadd.f32 %v270_v46, %v268_v47  ;;  %361 = vmatpush.bf16.msrb.mxu1 %v337_v44 }
 0x177   :  { %vm272_vm1 = vcmp.ge.f32.partialorder %v271_v48, 0.0  ;;  %v273_v49 = vmul.f32 0.2, %v271_v48 }
 0x179   :  { %v274_v51 = vsel %vm272_vm1, %v271_v48, %v273_v49  ;;  %362 = vmatpush.bf16.msrb.mxu1 %v335_v50 }
 0x17a   :  { %v275_v52 = vsub.f32 0.0, %v274_v51 }
 0x17c   :  { %v276_v54 = vmul.f32 1.442695, %v275_v52 }
 0x17d   :  { %363 = vmatpush.bf16.msrb.mxu1 %v333_v53 }
 0x17e   :  { %481 = vpow2.f32 %v276_v54 }
 0x180   :  { %364 = vmatmul.bf16.vlgmr.msrb.gmra.mxu1 %v323_v55 }
 0x184   :  { %v482_v57 = vpop.eup %481 }
 0x185   :  { %v280_v58 = vmul.f32 %v482_v57, %v279_v56 }
 0x187   :  { %281 = vadd.xlane.f32.xlu1 %v280_v58  ;;  %v283_v59 = vpack.c.bf16 %v280_v58, %v280_v58 }
 0x189   :  { %300 = vmatmul.bf16.vlgmr.msra.gmra.mxu3 %v283_v59 }
 0x1ca   :  { %v322_v62 = vpop.xlane.xlu2 %321 }
 0x1fa   :  { %v282_v63 = vpop.xlane.xlu1 %281 }
 0x1fb   :  { %v380_v0 = vsel %vm379_vm3, %v282_v63, %v322_v62 }
 0x1fc   :  { %v381_v1 = vadd.f32 %v380_v0, %v378_v61 }
 0x1fd   :  { %v365_v2 = vpop.f32.mrf.mxu1 }
 0x1fe   :  { %383 = vst.msk [vmem:[#allocation3] sm:$0xff] %vm61_vm2, %v381_v1 }
 0x205   :  { %v367_v3 = vpop.f32.mrf.mxu1  ;;  %v387_v4 = vld [vmem:[#allocation3] sm:$0xff] }
 0x206   :  { %vm388_vm4 = vcmp.gt.f32.partialorder %v387_v4, 0.0 }
 0x207   :  { %v389_v5 = vsel %vm388_vm4, %v387_v4, 1.0 }
 0x208   :  { %483 = vrcp.f32 %v389_v5 }
 0x20c   :  { %v301_v6 = vpop.f32.mrf.mxu3 }
 0x20e   :  { %v484_v8 = vpop.eup %483 }
 0x20f   :  { %394 = vperm.xlu0 %477, %v484_v8  }
 0x214   :  { %v303_v9 = vpop.f32.mrf.mxu3 }
 0x217   :  { %371 = vrot.lane.b32.xlu0 %v365_v2, %s569_s9 }
 0x218   :  { %478 = vset.pattern.permute.xlu0 %v571_v7 }
 0x21f   :  { %399 = vperm.xlu0 %478, %v484_v8  }
 0x281   :  { %v395_v10 = vpop.permute.xlu0 %394 }
 0x289   :  { %v372_v11 = vpop.permute.xlu0 %371 }
 0x28a   :  { %v375_v12 = vsel %vm374_vm5, %v301_v6, %v372_v11 }
 0x28b   :  { %v397_v14 = vmul.f32 %v395_v10, %v375_v12 }
 0x291   :  { %v400_v13 = vpop.permute.xlu0 %399 }
 0x292   :  { %v402_v15 = vmul.f32 %v400_v13, %v375_v12 }
 0x294   :  { %v403_v16 = vsel %vm374_vm5, %v397_v14, %v402_v15 }
 0x295   :  { %v405_v17 = vmul.f32 1.442695, %v403_v16  ;;  %vm404_vm6 = vcmp.gt.f32.partialorder %v403_v16, 0.0 }
 0x297   :  { %485 = vpow2.f32 %v405_v17 }
 0x29d   :  { %v486_v18 = vpop.eup %485 }
 0x29e   :  { %v428_v19 = vadd.f32 -1.0, %v486_v18 }
 0x2a0   :  { %v408_v7 = vsel %vm404_vm6, %v403_v16, %v428_v19 }
 0x2a1   :  { %409 = vst [vmem:[#allocation9] sm:$0xff] %v408_v7 }
 0x2a2   :  { %420 = dma.vmem_to_hbm [thread:$0]  %s416_s27, 128, %s418_s30, [#allocation6]  }
 0x2a3   :  { %563 = dma.done.wait [#allocation6], 128  }
 0x2a4   :  { %564 = vsyncadd [#allocation6], 4294967168 }
 0x2a5   :  { %425 = vsyncpa [#allocation5], 1 }
 0x2a6   :  { %426 = vsyncpa [#allocation8], 1 }
 0x2a7   :  { %427 = vsyncpa [#allocation6], 1 }

</bundles_post_ra>
